<compile_context>
chip_gen: v7x
topology: tpu7x:2x2x1
jax: 0.10.0
libtpu: 0.0.40
codegen_flags: <defaults>
</compile_context>

<pallas_src>
import functools

import jax
import jax.numpy as jnp
import numpy as np
from jax.experimental import pallas as pl
from jax.experimental.pallas import tpu as pltpu


def _round_up(x, m):
    return ((x + m - 1) // m) * m


def random_walk_mobility_kernel(
    scalars_ref,   # SMEM (6,)  f32: [Wearing_Alpha, Mobility_Alpha, RegionR, gi_beta, 1/gi_alpha, exp(psi)]
    cm_alpha_ref,  # SMEM (nC,) f32
    init_log_ref,  # VMEM (TR, 1) f32          -- InitialSize_log (plate_nRs)
    npis_ref,      # VMEM (nC, TR, W) f32
    wearing_ref,   # VMEM (TR, W) f32
    mobility_ref,  # VMEM (TR, W) f32
    csum_ref,      # VMEM (W, W) f32           -- lower-triangular ones (rows >= nWs zeroed)
    p_ref,         # VMEM (TR, W) f32  out: NB `p`
    infected_ref,  # VMEM (TR, W) f32  out: Infected
    *,
    n_cms,         # static: number of CM features (nCMs - 2)
):
    wearing_alpha  = scalars_ref[0]
    mobility_alpha = scalars_ref[1]
    region_r       = scalars_ref[2]
    gi_beta        = scalars_ref[3]
    inv_gi_alpha   = scalars_ref[4]
    r_nb           = scalars_ref[5]

    # --- CM reduction. VPU has no f32 FMA, so each term is a dependent mul+add; two
    # independent accumulator chains halve the exposed latency of the small unrolled case.
    if n_cms <= 16:
        acc_a = cm_alpha_ref[0] * npis_ref[0]
        acc_b = cm_alpha_ref[1] * npis_ref[1] if n_cms > 1 else None
        for c in range(2, n_cms, 2):
            acc_a = acc_a + cm_alpha_ref[c] * npis_ref[c]
        for c in range(3, n_cms, 2):
            acc_b = acc_b + cm_alpha_ref[c] * npis_ref[c]
        growth_reduction = acc_a if acc_b is None else acc_a + acc_b
    else:
        # Large nCM: bound code size / vreg live ranges with a dynamic-index loop.
        def body(c, acc):
            return acc + cm_alpha_ref[c] * npis_ref[c]
        growth_reduction = jax.lax.fori_loop(
            0, n_cms, body, jnp.zeros(npis_ref.shape[1:], jnp.float32), unroll=4)

    # --- wearing term.
    growth_reduction_wearing = wearing_alpha * wearing_ref[...]

    # --- mobility term: -log(2*exp(-m)/(1+exp(-m))) == softplus(m) - log(2); the log(2)
    # cancels in (gmob - gmob[:, 0:1]) and is dropped. Stable softplus keeps large |m| finite.
    m = mobility_alpha * mobility_ref[...]
    gmob = jnp.maximum(m, 0.0) + jnp.log(1.0 + jnp.exp(-jnp.abs(m)))

    expected_log_r = (region_r - growth_reduction - growth_reduction_wearing
                      - (gmob - gmob[:, 0:1]))

    # Timeseries transition mean: gi_beta + exp(ExpectedLogR)/gi_alpha  (-log(ones)=0).
    expected_growth = gi_beta + jnp.exp(expected_log_r) * inv_gi_alpha

    # --- cumulative sum over the time (lane) axis as one MXU matmul with a lower-triangular
    # ones matrix; rows >= nWs are zeroed in the matrix so padded lanes never pollute valid
    # columns (no in-kernel iota/masking needed). The MXU is otherwise idle in this kernel.
    # TODO(synk): for very long horizons (w_pad >> 1024) switch to per-128-lane-block
    # triangular matmuls plus a block-carry pass to bound the matrix footprint.
    cum = jnp.dot(expected_growth, csum_ref[...],
                  preferred_element_type=jnp.float32,
                  precision=jax.lax.Precision.HIGHEST)

    log_infected = init_log_ref[...] + cum
    infected = jnp.exp(log_infected)

    # p = r / (r + Infected) + 1e-8 via approx EUP reciprocal + one Newton step (VPU).
    # Guard the Infected-overflow case (denom = +inf): unguarded Newton would give NaN,
    # while the reference r/(r+inf) gives 0 and p = 1e-8.
    denom = r_nb + infected
    finite = denom < jnp.float32(jnp.inf)
    safe_denom = jnp.where(finite, denom, jnp.float32(1.0))
    inv = pl.reciprocal(safe_denom, approx=True)
    inv = inv * (2.0 - safe_denom * inv)          # Newton refinement -> ~f32-exact (load-bearing)
    p = jnp.where(finite, r_nb * inv, jnp.float32(0.0)) + jnp.float32(1e-8)

    infected_ref[...] = infected
    p_ref[...] = p


@jax.jit
def random_walk_mobility_forward(cm_alpha, wearing_alpha, mobility_alpha, region_r,
                                 gi_mean, gi_sd, psi, init_log,
                                 npis, wearing, mobility):
    """npis: (nRs, nCM_eff, nWs); wearing/mobility: (nRs, nWs); cm_alpha: (nCM_eff,);
    init_log: (nRs,). Remaining latents are scalars. Returns (p, Infected), each (nRs, nWs)."""
    nRs, nC, nWs = npis.shape
    f32 = jnp.float32

    # Time-axis padding only when it spans full vregs; for nWs < 128 the full-array block dim
    # is exempt from the (8,128) rule and padding would only inflate the npis DMA.
    w_pad = _round_up(nWs, 128) if nWs >= 128 else nWs
    # Region tiling: grid-parallel over regions (v7x 2-TC split, bounded per-step VMEM at
    # production shapes); collapses to a single grid step at demo size.
    r_pad = _round_up(nRs, 8)
    if r_pad <= 128:
        tr_ = r_pad
    else:
        tr_ = 128
        r_pad = _round_up(r_pad, tr_)
    grid = (r_pad // tr_,)

    # Scalar-only precompute (fused into the jitted graph; in-kernel divide becomes a multiply).
    gi_var = gi_sd * gi_sd
    gi_beta = jnp.exp(gi_mean / gi_var)
    inv_gi_alpha = gi_var / (gi_mean * gi_mean)          # == 1 / gi_alpha
    r_nb = jnp.exp(psi)
    scalars = jnp.stack([wearing_alpha, mobility_alpha, region_r,
                         gi_beta, inv_gi_alpha, r_nb]).astype(f32)

    # Relayout: CM axis outermost so the kernel does pure scalar-FMA accumulation.
    npis_t = jnp.transpose(npis.astype(f32), (1, 0, 2))                       # (nC, nRs, nWs)
    npis_p = jnp.pad(npis_t, ((0, 0), (0, r_pad - nRs), (0, w_pad - nWs)))
    wearing_p = jnp.pad(wearing.astype(f32), ((0, r_pad - nRs), (0, w_pad - nWs)))
    mobility_p = jnp.pad(mobility.astype(f32), ((0, r_pad - nRs), (0, w_pad - nWs)))
    init_p = jnp.pad(init_log.astype(f32).reshape(nRs, 1), ((0, r_pad - nRs), (0, 0)))
    cm_alpha_flat = cm_alpha.astype(f32).reshape(nC)

    # Lower-triangular ones matrix for the cumsum matmul; rows past nWs are zeroed so padded
    # time lanes contribute nothing to valid output columns.
    idx = jnp.arange(w_pad, dtype=jnp.int32)
    csum_mat = ((idx[:, None] <= idx[None, :]) & (idx[:, None] < nWs)).astype(f32)

    kernel = functools.partial(random_walk_mobility_kernel, n_cms=nC)

    # Explicit VMEM budget: per-step working set (inputs + outputs) with double-buffer +
    # headroom, floored at 16 MiB (>= v5e default scoped limit) and capped well below v7x's
    # 64 MiB physical VMEM.
    per_step_bytes = 4 * (nC * tr_ * w_pad + 2 * tr_ * w_pad + w_pad * w_pad
                          + tr_ + 2 * tr_ * w_pad)
    vmem_limit = int(min(max(4 * per_step_bytes, 16 << 20), 48 << 20))

    p_pad, inf_pad = pl.pallas_call(
        kernel,
        out_shape=(jax.ShapeDtypeStruct((r_pad, w_pad), f32),
                   jax.ShapeDtypeStruct((r_pad, w_pad), f32)),
        grid=grid,
        in_specs=[
            pl.BlockSpec(memory_space=pltpu.MemorySpace.SMEM),            # scalars (6,)
            pl.BlockSpec(memory_space=pltpu.MemorySpace.SMEM),            # cm_alpha (nC,)
            pl.BlockSpec((tr_, 1), lambda i: (i, 0)),                     # init_log
            pl.BlockSpec((nC, tr_, w_pad), lambda i: (0, i, 0)),          # npis
            pl.BlockSpec((tr_, w_pad), lambda i: (i, 0)),                 # wearing
            pl.BlockSpec((tr_, w_pad), lambda i: (i, 0)),                 # mobility
            pl.BlockSpec((w_pad, w_pad), lambda i: (0, 0)),               # csum matrix
        ],
        out_specs=(
            pl.BlockSpec((tr_, w_pad), lambda i: (i, 0)),
            pl.BlockSpec((tr_, w_pad), lambda i: (i, 0)),
        ),
        compiler_params=pltpu.CompilerParams(
            dimension_semantics=("parallel",),
            vmem_limit_bytes=vmem_limit),
    )(scalars, cm_alpha_flat, init_p, npis_p, wearing_p, mobility_p, csum_mat)

    return p_pad[:nRs, :nWs], inf_pad[:nRs, :nWs]


def reference_forward(cm_alpha, wearing_alpha, mobility_alpha, region_r,
                      gi_mean, gi_sd, psi, init_log, npis, wearing, mobility):
    """Pure-JAX reference in the original module's formulation."""
    gr = jnp.sum(npis * cm_alpha.reshape(1, -1, 1), axis=1)
    gw = wearing_alpha * wearing
    m = mobility_alpha * mobility
    gmob = -1.0 * jnp.log(2.0 * jnp.exp(-m) / (1.0 + jnp.exp(-m)))
    elr = region_r - gr - gw - (gmob - gmob[:, 0:1])
    gi_beta = jnp.exp(gi_mean / gi_sd ** 2)
    gi_alpha = gi_mean ** 2 / gi_sd ** 2
    eg = gi_beta + jnp.exp(elr) / gi_alpha
    li = init_log.reshape(-1, 1) + jnp.cumsum(eg, axis=-1)
    inf_ = jnp.exp(li)
    r = jnp.exp(psi)
    p = r / (r + inf_) + 1e-8
    return p, inf_


if __name__ == "__main__":
    # Small shapes consistent with the model: nRs regions, nCMs CM features
    # (last two are mobility / wearing, so nCM_eff = nCMs - 2), nWs weekly steps.
    nRs, nCMs, nWs = 8, 10, 8
    nCM_eff = nCMs - 2

    key = jax.random.PRNGKey(0)
    k1, k2, k3, k4 = jax.random.split(key, 4)

    # Data (ActiveCMs features), deterministic from PRNGKey(0).
    npis = jax.random.uniform(k1, (nRs, nCM_eff, nWs), dtype=jnp.float32)
    wearing = jax.random.uniform(k2, (nRs, nWs), dtype=jnp.float32)
    mobility = jax.random.uniform(k3, (nRs, nWs), dtype=jnp.float32)

    # Latent parameters, deterministically initialized near their prior means.
    cm_alpha = 0.05 * jax.random.normal(k4, (nCM_eff,), dtype=jnp.float32)
    init_log = 0.5 + 0.05 * jnp.arange(nRs, dtype=jnp.float32)
    wearing_alpha  = jnp.float32(0.1)            # Wearing_Alpha  (prior mean wearing_mean≈0)
    mobility_alpha = jnp.float32(1.704)          # Mobility_Alpha (prior mean mobility_mean)
    region_r       = jnp.float32(1.07)           # RegionR        (prior mean R_prior_mean_mean)
    gi_mean        = jnp.float32(np.log(5.06))   # GI_mean        (prior mean log(gi_mean_mean))
    gi_sd          = jnp.float32(2.11)           # GI_sd          (prior mean gi_sd_mean)
    psi            = jnp.float32(np.log(45.0))   # psi            (prior mean log(45))

    p, infected = random_walk_mobility_forward(
        cm_alpha, wearing_alpha, mobility_alpha, region_r,
        gi_mean, gi_sd, psi, init_log, npis, wearing, mobility)
    jax.block_until_ready((p, infected))

    p_ref, inf_ref = reference_forward(
        cm_alpha, wearing_alpha, mobility_alpha, region_r,
        gi_mean, gi_sd, psi, init_log, npis, wearing, mobility)

    np.testing.assert_allclose(np.asarray(p), np.asarray(p_ref), rtol=1e-4, atol=1e-6)
    np.testing.assert_allclose(np.asarray(infected), np.asarray(inf_ref), rtol=2e-4)

    print("KERNEL_OK")
</pallas_src>

<mosaic_0001>
module attributes {stable_mosaic.version = 11 : i64} {
  func.func @random_walk_mobility_kernel(%arg0: i32, %arg1: memref<6xf32, #tpu.memory_space<smem>>, %arg2: memref<8xf32, #tpu.memory_space<smem>>, %arg3: memref<8x1xf32, #tpu.memory_space<vmem>>, %arg4: memref<8x8x8xf32, #tpu.memory_space<vmem>>, %arg5: memref<8x8xf32, #tpu.memory_space<vmem>>, %arg6: memref<8x8xf32, #tpu.memory_space<vmem>>, %arg7: memref<8x8xf32, #tpu.memory_space<vmem>>, %arg8: memref<8x8xf32, #tpu.memory_space<vmem>>, %arg9: memref<8x8xf32, #tpu.memory_space<vmem>>) attributes {dimension_semantics = [#tpu.dimension_semantics<parallel>], iteration_bounds = array<i64: 1>, scalar_prefetch = 0 : i64, scratch_operands = 0 : i64, tpu.core_type = #tpu.core_type<tc>, window_params = [{transform_indices = @transform_0, window_bounds = array<i64: 6>}, {transform_indices = @transform_1, window_bounds = array<i64: 8>}, {transform_indices = @transform_2, window_bounds = array<i64: 8, 1>}, {transform_indices = @transform_3, window_bounds = array<i64: 8, 8, 8>}, {transform_indices = @transform_4, window_bounds = array<i64: 8, 8>}, {transform_indices = @transform_5, window_bounds = array<i64: 8, 8>}, {pipeline_mode = #tpu.pipeline_mode<synchronous>, transform_indices = @transform_6, window_bounds = array<i64: 8, 8>}, {transform_indices = @transform_7, window_bounds = array<i64: 8, 8>}, {transform_indices = @transform_8, window_bounds = array<i64: 8, 8>}]} {
    %c0 = arith.constant 0 : index
    %0 = memref.load %arg1[%c0] : memref<6xf32, #tpu.memory_space<smem>>
    %c1 = arith.constant 1 : index
    %1 = memref.load %arg1[%c1] : memref<6xf32, #tpu.memory_space<smem>>
    %c2 = arith.constant 2 : index
    %2 = memref.load %arg1[%c2] : memref<6xf32, #tpu.memory_space<smem>>
    %c3 = arith.constant 3 : index
    %3 = memref.load %arg1[%c3] : memref<6xf32, #tpu.memory_space<smem>>
    %c4 = arith.constant 4 : index
    %4 = memref.load %arg1[%c4] : memref<6xf32, #tpu.memory_space<smem>>
    %c5 = arith.constant 5 : index
    %5 = memref.load %arg1[%c5] : memref<6xf32, #tpu.memory_space<smem>>
    %c0_0 = arith.constant 0 : index
    %6 = memref.load %arg2[%c0_0] : memref<8xf32, #tpu.memory_space<smem>>
    %c0_1 = arith.constant 0 : index
    %c0_2 = arith.constant 0 : index
    %c0_3 = arith.constant 0 : index
    %7 = vector.load %arg4[%c0_1, %c0_2, %c0_3] : memref<8x8x8xf32, #tpu.memory_space<vmem>>, vector<1x8x8xf32>
    %8 = vector.shape_cast %7 : vector<1x8x8xf32> to vector<8x8xf32>
    %9 = vector.broadcast %6 : f32 to vector<8x8xf32>
    %10 = arith.mulf %9, %8 : vector<8x8xf32>
    %c1_4 = arith.constant 1 : index
    %11 = memref.load %arg2[%c1_4] : memref<8xf32, #tpu.memory_space<smem>>
    %c1_5 = arith.constant 1 : index
    %c0_6 = arith.constant 0 : index
    %c0_7 = arith.constant 0 : index
    %12 = vector.load %arg4[%c1_5, %c0_6, %c0_7] : memref<8x8x8xf32, #tpu.memory_space<vmem>>, vector<1x8x8xf32>
    %13 = vector.shape_cast %12 : vector<1x8x8xf32> to vector<8x8xf32>
    %14 = vector.broadcast %11 : f32 to vector<8x8xf32>
    %15 = arith.mulf %14, %13 : vector<8x8xf32>
    %c2_8 = arith.constant 2 : index
    %16 = memref.load %arg2[%c2_8] : memref<8xf32, #tpu.memory_space<smem>>
    %c2_9 = arith.constant 2 : index
    %c0_10 = arith.constant 0 : index
    %c0_11 = arith.constant 0 : index
    %17 = vector.load %arg4[%c2_9, %c0_10, %c0_11] : memref<8x8x8xf32, #tpu.memory_space<vmem>>, vector<1x8x8xf32>
    %18 = vector.shape_cast %17 : vector<1x8x8xf32> to vector<8x8xf32>
    %19 = vector.broadcast %16 : f32 to vector<8x8xf32>
    %20 = arith.mulf %19, %18 : vector<8x8xf32>
    %21 = arith.addf %10, %20 : vector<8x8xf32>
    %c4_12 = arith.constant 4 : index
    %22 = memref.load %arg2[%c4_12] : memref<8xf32, #tpu.memory_space<smem>>
    %c4_13 = arith.constant 4 : index
    %c0_14 = arith.constant 0 : index
    %c0_15 = arith.constant 0 : index
    %23 = vector.load %arg4[%c4_13, %c0_14, %c0_15] : memref<8x8x8xf32, #tpu.memory_space<vmem>>, vector<1x8x8xf32>
    %24 = vector.shape_cast %23 : vector<1x8x8xf32> to vector<8x8xf32>
    %25 = vector.broadcast %22 : f32 to vector<8x8xf32>
    %26 = arith.mulf %25, %24 : vector<8x8xf32>
    %27 = arith.addf %21, %26 : vector<8x8xf32>
    %c6 = arith.constant 6 : index
    %28 = memref.load %arg2[%c6] : memref<8xf32, #tpu.memory_space<smem>>
    %c6_16 = arith.constant 6 : index
    %c0_17 = arith.constant 0 : index
    %c0_18 = arith.constant 0 : index
    %29 = vector.load %arg4[%c6_16, %c0_17, %c0_18] : memref<8x8x8xf32, #tpu.memory_space<vmem>>, vector<1x8x8xf32>
    %30 = vector.shape_cast %29 : vector<1x8x8xf32> to vector<8x8xf32>
    %31 = vector.broadcast %28 : f32 to vector<8x8xf32>
    %32 = arith.mulf %31, %30 : vector<8x8xf32>
    %33 = arith.addf %27, %32 : vector<8x8xf32>
    %c3_19 = arith.constant 3 : index
    %34 = memref.load %arg2[%c3_19] : memref<8xf32, #tpu.memory_space<smem>>
    %c3_20 = arith.constant 3 : index
    %c0_21 = arith.constant 0 : index
    %c0_22 = arith.constant 0 : index
    %35 = vector.load %arg4[%c3_20, %c0_21, %c0_22] : memref<8x8x8xf32, #tpu.memory_space<vmem>>, vector<1x8x8xf32>
    %36 = vector.shape_cast %35 : vector<1x8x8xf32> to vector<8x8xf32>
    %37 = vector.broadcast %34 : f32 to vector<8x8xf32>
    %38 = arith.mulf %37, %36 : vector<8x8xf32>
    %39 = arith.addf %15, %38 : vector<8x8xf32>
    %c5_23 = arith.constant 5 : index
    %40 = memref.load %arg2[%c5_23] : memref<8xf32, #tpu.memory_space<smem>>
    %c5_24 = arith.constant 5 : index
    %c0_25 = arith.constant 0 : index
    %c0_26 = arith.constant 0 : index
    %41 = vector.load %arg4[%c5_24, %c0_25, %c0_26] : memref<8x8x8xf32, #tpu.memory_space<vmem>>, vector<1x8x8xf32>
    %42 = vector.shape_cast %41 : vector<1x8x8xf32> to vector<8x8xf32>
    %43 = vector.broadcast %40 : f32 to vector<8x8xf32>
    %44 = arith.mulf %43, %42 : vector<8x8xf32>
    %45 = arith.addf %39, %44 : vector<8x8xf32>
    %c7 = arith.constant 7 : index
    %46 = memref.load %arg2[%c7] : memref<8xf32, #tpu.memory_space<smem>>
    %c7_27 = arith.constant 7 : index
    %c0_28 = arith.constant 0 : index
    %c0_29 = arith.constant 0 : index
    %47 = vector.load %arg4[%c7_27, %c0_28, %c0_29] : memref<8x8x8xf32, #tpu.memory_space<vmem>>, vector<1x8x8xf32>
    %48 = vector.shape_cast %47 : vector<1x8x8xf32> to vector<8x8xf32>
    %49 = vector.broadcast %46 : f32 to vector<8x8xf32>
    %50 = arith.mulf %49, %48 : vector<8x8xf32>
    %51 = arith.addf %45, %50 : vector<8x8xf32>
    %52 = arith.addf %33, %51 : vector<8x8xf32>
    %c0_30 = arith.constant 0 : index
    %c0_31 = arith.constant 0 : index
    %53 = vector.load %arg5[%c0_30, %c0_31] : memref<8x8xf32, #tpu.memory_space<vmem>>, vector<8x8xf32>
    %54 = vector.broadcast %0 : f32 to vector<8x8xf32>
    %55 = arith.mulf %54, %53 : vector<8x8xf32>
    %c0_32 = arith.constant 0 : index
    %c0_33 = arith.constant 0 : index
    %56 = vector.load %arg6[%c0_32, %c0_33] : memref<8x8xf32, #tpu.memory_space<vmem>>, vector<8x8xf32>
    %57 = vector.broadcast %1 : f32 to vector<8x8xf32>
    %58 = arith.mulf %57, %56 : vector<8x8xf32>
    %cst = arith.constant 0.000000e+00 : f32
    %59 = vector.broadcast %cst : f32 to vector<8x8xf32>
    %60 = arith.maximumf %58, %59 : vector<8x8xf32>
    %61 = math.absf %58 : vector<8x8xf32>
    %cst_34 = arith.constant 0.000000e+00 : f32
    %62 = vector.broadcast %cst_34 : f32 to vector<8x8xf32>
    %63 = arith.subf %62, %61 : vector<8x8xf32>
    %64 = math.exp %63 : vector<8x8xf32>
    %cst_35 = arith.constant 1.000000e+00 : f32
    %65 = vector.broadcast %cst_35 : f32 to vector<8x8xf32>
    %66 = arith.addf %65, %64 : vector<8x8xf32>
    %67 = math.log %66 : vector<8x8xf32>
    %68 = arith.addf %60, %67 : vector<8x8xf32>
    %69 = vector.broadcast %2 : f32 to vector<8x8xf32>
    %70 = arith.subf %69, %52 : vector<8x8xf32>
    %71 = arith.subf %70, %55 : vector<8x8xf32>
    %72 = vector.extract_strided_slice %68 {offsets = [0, 0], sizes = [8, 1], strides = [1, 1]} : vector<8x8xf32> to vector<8x1xf32>
    %73 = vector.broadcast %72 : vector<8x1xf32> to vector<8x8xf32>
    %74 = arith.subf %68, %73 : vector<8x8xf32>
    %75 = arith.subf %71, %74 : vector<8x8xf32>
    %76 = math.exp %75 : vector<8x8xf32>
    %77 = vector.broadcast %4 : f32 to vector<8x8xf32>
    %78 = arith.mulf %76, %77 : vector<8x8xf32>
    %79 = vector.broadcast %3 : f32 to vector<8x8xf32>
    %80 = arith.addf %79, %78 : vector<8x8xf32>
    %c0_36 = arith.constant 0 : index
    %c0_37 = arith.constant 0 : index
    %81 = vector.load %arg7[%c0_36, %c0_37] : memref<8x8xf32, #tpu.memory_space<vmem>>, vector<8x8xf32>
    %cst_38 = arith.constant dense<0.000000e+00> : vector<8x8xf32>
    %82 = tpu.matmul %80, %81, %cst_38 {dimension_numbers = #tpu.dot_dimension_numbers<[1], [0], [0], [1], [0, 0, 1, 1], [], []>, precision = #tpu.contract_precision<fp32>} : vector<8x8xf32>, vector<8x8xf32>, vector<8x8xf32> -> vector<8x8xf32>
    %c0_39 = arith.constant 0 : index
    %c0_40 = arith.constant 0 : index
    %83 = vector.load %arg3[%c0_39, %c0_40] : memref<8x1xf32, #tpu.memory_space<vmem>>, vector<8x1xf32>
    %84 = vector.broadcast %83 : vector<8x1xf32> to vector<8x8xf32>
    %85 = arith.addf %84, %82 : vector<8x8xf32>
    %86 = math.exp %85 : vector<8x8xf32>
    %87 = vector.broadcast %5 : f32 to vector<8x8xf32>
    %88 = arith.addf %87, %86 : vector<8x8xf32>
    %cst_41 = arith.constant 0x7F800000 : f32
    %89 = vector.broadcast %cst_41 : f32 to vector<8x8xf32>
    %90 = arith.cmpf olt, %88, %89 : vector<8x8xf32>
    %cst_42 = arith.constant 1.000000e+00 : f32
    %91 = vector.broadcast %cst_42 : f32 to vector<8x8xf32>
    %92 = arith.select %90, %88, %91 : vector<8x8xi1>, vector<8x8xf32>
    %93 = tpu.reciprocal %92 {approx = true} : vector<8x8xf32> -> vector<8x8xf32>
    %94 = arith.mulf %92, %93 : vector<8x8xf32>
    %cst_43 = arith.constant 2.000000e+00 : f32
    %95 = vector.broadcast %cst_43 : f32 to vector<8x8xf32>
    %96 = arith.subf %95, %94 : vector<8x8xf32>
    %97 = arith.mulf %93, %96 : vector<8x8xf32>
    %98 = vector.broadcast %5 : f32 to vector<8x8xf32>
    %99 = arith.mulf %98, %97 : vector<8x8xf32>
    %cst_44 = arith.constant 0.000000e+00 : f32
    %100 = vector.broadcast %cst_44 : f32 to vector<8x8xf32>
    %101 = arith.select %90, %99, %100 : vector<8x8xi1>, vector<8x8xf32>
    %cst_45 = arith.constant 9.99999993E-9 : f32
    %102 = vector.broadcast %cst_45 : f32 to vector<8x8xf32>
    %103 = arith.addf %101, %102 : vector<8x8xf32>
    %c0_46 = arith.constant 0 : index
    %c0_47 = arith.constant 0 : index
    %104 = vector.load %arg9[%c0_46, %c0_47] : memref<8x8xf32, #tpu.memory_space<vmem>>, vector<8x8xf32>
    tpu.vector_store %arg9[%c0_46, %c0_47], %86 {strides = array<i32>} : memref<8x8xf32, #tpu.memory_space<vmem>>, vector<8x8xf32>,
    %c0_48 = arith.constant 0 : index
    %c0_49 = arith.constant 0 : index
    %105 = vector.load %arg8[%c0_48, %c0_49] : memref<8x8xf32, #tpu.memory_space<vmem>>, vector<8x8xf32>
    tpu.vector_store %arg8[%c0_48, %c0_49], %103 {strides = array<i32>} : memref<8x8xf32, #tpu.memory_space<vmem>>, vector<8x8xf32>,
    return
  }
  func.func @transform_0(%arg0: i32) -> i32 {
    %c0_i32 = arith.constant 0 : i32
    %c0_i32_0 = arith.constant 0 : i32
    return %c0_i32 : i32
  }
  func.func @transform_1(%arg0: i32) -> i32 {
    %c0_i32 = arith.constant 0 : i32
    %c0_i32_0 = arith.constant 0 : i32
    return %c0_i32 : i32
  }
  func.func @transform_2(%arg0: i32) -> (i32, i32) {
    %c0_i32 = arith.constant 0 : i32
    %c0_i32_0 = arith.constant 0 : i32
    return %arg0, %c0_i32 : i32, i32
  }
  func.func @transform_3(%arg0: i32) -> (i32, i32, i32) {
    %c0_i32 = arith.constant 0 : i32
    %c0_i32_0 = arith.constant 0 : i32
    %c0_i32_1 = arith.constant 0 : i32
    return %c0_i32, %arg0, %c0_i32_0 : i32, i32, i32
  }
  func.func @transform_4(%arg0: i32) -> (i32, i32) {
    %c0_i32 = arith.constant 0 : i32
    %c0_i32_0 = arith.constant 0 : i32
    return %arg0, %c0_i32 : i32, i32
  }
  func.func @transform_5(%arg0: i32) -> (i32, i32) {
    %c0_i32 = arith.constant 0 : i32
    %c0_i32_0 = arith.constant 0 : i32
    return %arg0, %c0_i32 : i32, i32
  }
  func.func @transform_6(%arg0: i32) -> (i32, i32) {
    %c0_i32 = arith.constant 0 : i32
    %c0_i32_0 = arith.constant 0 : i32
    %c0_i32_1 = arith.constant 0 : i32
    return %c0_i32, %c0_i32_0 : i32, i32
  }
  func.func @transform_7(%arg0: i32) -> (i32, i32) {
    %c0_i32 = arith.constant 0 : i32
    %c0_i32_0 = arith.constant 0 : i32
    return %arg0, %c0_i32 : i32, i32
  }
  func.func @transform_8(%arg0: i32) -> (i32, i32) {
    %c0_i32 = arith.constant 0 : i32
    %c0_i32_0 = arith.constant 0 : i32
    return %arg0, %c0_i32 : i32, i32
  }
}

</mosaic_0001>

<bundles_post_ra>
// kernel: random_walk_mobility_forward.1
= control target key start
LH: loop header
LB: loop body
LE: loop exit
PB: predicated region body
PF: predicated region fallthrough
CT: control target
= control target key end

     0   :  { %14 = vsyncpa [#allocation4], 0  ;;  %s954_s0 = inlined_call_operand.vmem [shape: f32[6], index: 0, kind: input, shape index: {}]   ;;  %s955_s1 = inlined_call_operand.vmem [shape: f32[8], index: 1, kind: input, shape index: {}]   ;;  %s956_s2 = inlined_call_operand.vmem [shape: f32[8,1], index: 2, kind: input, shape index: {}]   ;;  %s957_s3 = inlined_call_operand.vmem [shape: f32[8,8,8], index: 3, kind: input, shape index: {}]   ;;  %s958_s4 = inlined_call_operand.vmem [shape: f32[8,8], index: 4, kind: input, shape index: {}]   ;;  %s959_s5 = inlined_call_operand.vmem [shape: f32[8,8], index: 5, kind: input, shape index: {}]   ;;  %s960_s6 = inlined_call_operand.vmem [shape: f32[8,8], index: 6, kind: input, shape index: {}]   ;;  %s961_s7 = inlined_call_operand.hbm [shape: f32[8,8], index: 7, kind: output, shape index: {0}]   ;;  %s962_s8 = inlined_call_operand.hbm [shape: f32[8,8], index: 8, kind: output, shape index: {1}]  }
   0x1   :  { %15 = vsyncpa [#allocation6], 0 }
   0x2   :  { %16 = vsyncpa [#allocation3], 0 }
   0x3   :  { %17 = vsyncpa [#allocation9], 0  ;;  %s24_s29 = sshll.u32 %s954_s0, 4  ;;  %s34_s10 = sshll.u32 %s955_s1, 4  ;;  %s25_s29 = int_to_ptr.vmem [resolvable:$true] %s24_s29  ;;  %s35_s10 = int_to_ptr.vmem [resolvable:$true] %s34_s10 }
   0x4   :  { %s720_s11 = scalar_lea.vmem %s25_s29, 16  ;;  %p725_p1 = scmp.lt.s32.totalorder %s25_s29, %s25_s29 }
   0x5   :  { %p721_p0 = scmp.ne.s32.totalorder %s25_s29, %s720_s11  ;;  %p726_p2 = scmp.lt.s32.totalorder %s720_s11, %s720_s11 }
   0x7   :  { %p727_p3 = por %p726_p2, %p725_p1 }
   0x9   :  { %p728_p4 = pnand %p727_p3, %p721_p0 }
   0xb   :  { %731 = shalt.err (!%p728_p4)
}
   0xc   :  { %s796_s12 = smov [#allocation2]   ;;  %s732_s13 = scalar_lea.vmem %s35_s10, 16 }
   0xd   :  { %27 = dma.vmem_to_smem %s25_s29, 16, %s796_s12, [#allocation4]  }
   0xe   :  { %p733_p5 = scmp.ne.s32.totalorder %s35_s10, %s732_s13  ;;  %p737_p6 = scmp.lt.s32.totalorder %s35_s10, %s35_s10 }
   0xf   :  { %p738_p7 = scmp.lt.s32.totalorder %s732_s13, %s732_s13 }
  0x11   :  { %p739_p8 = por %p738_p7, %p737_p6 }
  0x13   :  { %p740_p9 = pnand %p739_p8, %p733_p5 }
  0x15   :  { %743 = shalt.err (!%p740_p9)
}
  0x16   :  { %s797_s0 = smov [#allocation5]  }
  0x17   :  { %37 = dma.vmem_to_smem %s35_s10, 16, %s797_s0, [#allocation6]  }
  0x18   :  { %788 = dma.done.wait [#allocation4], 16  }
  0x19   :  { %789 = vsyncadd [#allocation4], 4294967280 }
  0x1a   :  { %790 = dma.done.wait [#allocation6], 16  }
  0x1b   :  { %791 = vsyncadd [#allocation6], 4294967280 }
  0x1c   :  { %54 = sfence }
  0x1d   :  { %s641_s1 = sld [smem:[#allocation2 + $0x1]]  ;;  %v798_v0 = vmov 0   ;;  %v110_v1 = vld [vmem:[%s959_s5] sm:$0xff]  ;;  %v799_v15 = vmov 0.0   ;;  %vm800_vm0 = vmmov 0   ;;  %s648_s19 = sld [smem:[#allocation5 + $0x2]] }
  0x1e   :  { %709 = vset.pattern.permute.xlu0 %v798_v0  ;;  %v589_v13 = vld [vmem:[%s956_s2] sm:$0xff]  ;;  %677 = vmatprep.subr.mxu1 %v799_v15  ;;  %s61_s2 = sld [smem:[#allocation5]]  ;;  %s654_s20 = sld [smem:[#allocation5 + $0x3]]  ;;  %v647_v22 = vld [vmem:[%s957_s3 + $0x8] sm:$0xff]  ;;  %v649_v23 = vld [vmem:[%s957_s3 + $0x10] sm:$0xff]  ;;  %vm139_vm1 = vcmask 64512  }
  0x1f   :  { %v138_v14 = vld [vmem:[%s960_s6] sm:$0xff]  ;;  %679 = vmatprep.mubr.msk.f32.mxu1 %vm800_vm0, %v799_v15  ;;  %672 = vmatprep.subr.mxu0 %v799_v15  ;;  %s646_s6 = sld [smem:[#allocation5 + $0x1]]  ;;  %s650_s21 = sld [smem:[#allocation5 + $0x4]]  ;;  %v655_v24 = vld [vmem:[%s957_s3 + $0x18] sm:$0xff]  ;;  %v657_v35 = vld [vmem:[%s957_s3 + $0x28] sm:$0xff] }
  0x20   :  { %v867_v16 = vand.u32 4294901760, %v138_v14  ;;  %674 = vmatprep.mubr.msk.f32.mxu0 %vm800_vm0, %v799_v15  ;;  %s656_s22 = sld [smem:[#allocation5 + $0x5]]  ;;  %v62_v21 = vld [vmem:[%s957_s3] sm:$0xff]  ;;  %s652_s9 = sld [smem:[#allocation5 + $0x6]]  ;;  %v653_v41 = vld [vmem:[%s957_s3 + $0x30] sm:$0xff]  ;;  %v659_v43 = vld [vmem:[%s957_s3 + $0x38] sm:$0xff] }
  0x21   :  { %s658_s10 = sld [smem:[#allocation5 + $0x7]]  ;;  %v651_v33 = vld [vmem:[%s957_s3 + $0x20] sm:$0xff]  ;;  %s642_s17 = sld [smem:[#allocation2 + $0x2]] }
  0x22   :  { %v875_v17 = vsub.f32 %v138_v14, %v867_v16  ;;  %673 = vmatpush3.msra.mxu0 %v867_v16  ;;  %s55_s5 = sld [smem:[#allocation2]]  ;;  %v107_v52 = vld [vmem:[%s958_s4] sm:$0xff]  ;;  %s644_s3 = sld [smem:[#allocation2 + $0x4]] }
  0x23   :  { %v111_v2 = vstv %s641_s1  ;;  %682 = vmatprep.subr.mxu0 %v799_v15  ;;  %v73_v27 = vstv %s648_s19  ;;  %s645_s4 = sld [smem:[#allocation2 + $0x5]]  ;;  %s801_s19 = smov [#allocation8]  }
  0x24   :  { %v112_v3 = vmul.f32 %v111_v2, %v110_v1  ;;  %v222_v18 = vand.u32 4294901760, %v875_v17  ;;  %v63_v25 = vstv %s61_s2  ;;  %v91_v28 = vstv %s654_s20  ;;  %s627_s20 = sshll.u32 %s801_s19, 4  ;;  %s628_s20 = int_to_ptr.vmem [resolvable:$true] %s627_s20 }
  0x25   :  { %v68_v26 = vstv %s646_s6  ;;  %v64_v29 = vmul.f32 %v63_v25, %v62_v21  ;;  %v74_v31 = vmul.f32 %v649_v23, %v73_v27  ;;  %v92_v32 = vmul.f32 %v655_v24, %v91_v28  ;;  %s643_s6 = sld [smem:[#allocation2 + $0x3]]  ;;  %p749_p11 = scmp.lt.s32.totalorder %s628_s20, %s628_s20 }
  0x26   :  { %v114_v4 = vand.u32 2147483647, %v112_v3  ;;  %v113_v9 = vmax.f32 %v112_v3, 0.0  ;;  %v223_v19 = vsub.f32 %v875_v17, %v222_v18  ;;  %v69_v30 = vmul.f32 %v647_v22, %v68_v26 }
  0x27   :  { %v79_v34 = vstv %s650_s21  ;;  %v97_v36 = vstv %s656_s22  ;;  %v75_v37 = vadd.f32 %v74_v31, %v64_v29  ;;  %v85_v42 = vstv %s652_s9  ;;  %s744_s21 = scalar_lea.vmem %s628_s20, 128 }
  0x28   :  { %v115_v5 = vsub.f32 0.0, %v114_v4  ;;  %v224_v20 = vand.u32 4294901760, %v223_v19  ;;  %v80_v38 = vmul.f32 %v651_v33, %v79_v34  ;;  %v93_v39 = vadd.f32 %v92_v32, %v69_v30  ;;  %p745_p10 = scmp.ne.s32.totalorder %s628_s20, %s744_s21  ;;  %p750_p12 = scmp.lt.s32.totalorder %s744_s21, %s744_s21 }
  0x29   :  { %v98_v40 = vmul.f32 %v657_v35, %v97_v36  ;;  %v103_v44 = vstv %s658_s10  ;;  %v86_v46 = vmul.f32 %v653_v41, %v85_v42  ;;  %v122_v53 = vstv %s642_s17 }
  0x2a   :  { %v116_v6 = vmul.f32 1.442695, %v115_v5  ;;  %678 = vmatpush3.msra.mxu1 %v224_v20  ;;  %v81_v45 = vadd.f32 %v80_v38, %v75_v37  ;;  %v104_v48 = vmul.f32 %v659_v43, %v103_v44  ;;  %v108_v54 = vstv %s55_s5  ;;  %p751_p13 = por %p750_p12, %p749_p11 }
  0x2b   :  { %687 = vmatprep.subr.mxu1 %v799_v15  ;;  %v99_v47 = vadd.f32 %v98_v40, %v93_v39  ;;  %v109_v56 = vmul.f32 %v108_v54, %v107_v52  ;;  %v134_v62 = vstv %s644_s3  ;;  %v136_v0 = vstv %s643_s6 }
  0x2c   :  { %710 = vpow2.f32 %v116_v6  ;;  %v87_v49 = vadd.f32 %v86_v46, %v81_v45  ;;  %v598_v29 = vstv %s645_s4  ;;  %p752_p0 = pnand %p751_p13, %p745_p10 }
  0x2d   :  { %v105_v50 = vadd.f32 %v104_v48, %v99_v47 }
  0x2f   :  { %v106_v51 = vadd.f32 %v105_v50, %v87_v49 }
  0x31   :  { %v123_v55 = vsub.f32 %v122_v53, %v106_v51 }
  0x33   :  { %v124_v57 = vsub.f32 %v123_v55, %v109_v56 }
  0x36   :  { %v711_v7 = vpop.eup %710 }
  0x37   :  { %v118_v8 = vadd.f32 1.0, %v711_v7 }
  0x39   :  { %712 = vlog2.f32 %v118_v8 }
  0x43   :  { %v713_v10 = vpop.eup %712 }
  0x44   :  { %v120_v11 = vmul.f32 0.6931472, %v713_v10 }
  0x46   :  { %v857_v12 = vadd.f32 %v120_v11, %v113_v9 }
  0x48   :  { %127 = vperm.xlu0 %709, %v857_v12  }
  0x4c   :  { %592 = vperm.xlu0 %709, %v589_v13  }
  0xc7   :  { %v128_v58 = vpop.permute.xlu0 %127 }
  0xc8   :  { %v130_v59 = vsub.f32 %v857_v12, %v128_v58 }
  0xca   :  { %v131_v60 = vsub.f32 %v124_v57, %v130_v59 }
  0xcb   :  { %v593_v27 = vpop.permute.xlu0 %592 }
  0xcc   :  { %v132_v61 = vmul.f32 1.442695, %v131_v60 }
  0xce   :  { %714 = vpow2.f32 %v132_v61 }
  0xd8   :  { %v715_v63 = vpop.eup %714 }
  0xd9   :  { %v135_v1 = vmul.f32 %v715_v63, %v134_v62 }
  0xdb   :  { %v137_v2 = vadd.f32 %v136_v0, %v135_v1 }
  0xdd   :  { %v141_v3 = vsel %vm139_vm1, %v137_v2, 0 }
  0xde   :  { %v209_v4 = vand.u32 4294901760, %v141_v3 }
  0xe0   :  { %v210_v5 = vsub.f32 %v141_v3, %v209_v4  ;;  %680 = vmatmul.mubr.f32.vlgmr.msra.gmra.mrb[0].mxu1 %v209_v4 }
  0xe1   :  { %688 = vmatpush3.msra.mxu1 %v867_v16  ;;  %689 = vmatprep.mubr.msk.f32.mxu1 %vm800_vm0, %v799_v15 }
  0xe2   :  { %v211_v6 = vand.u32 4294901760, %v210_v5  ;;  %697 = vmatprep.subr.mxu1 %v799_v15 }
  0xe4   :  { %690 = vmatmul.mubr.f32.vlgmr.msra.gmra.mrb[2].mxu1 %v211_v6  ;;  %v212_v7 = vsub.f32 %v210_v5, %v211_v6 }
  0xe5   :  { %698 = vmatpush3.msra.mxu1 %v867_v16  ;;  %699 = vmatprep.mubr.msk.f32.mxu1 %vm800_vm0, %v799_v15 }
  0xe6   :  { %v213_v8 = vand.u32 4294901760, %v212_v7 }
  0xe8   :  { %675 = vmatmul.mubr.f32.vlgmr.msra.gmra.mrb[0].mxu0 %v213_v8  ;;  %700 = vmatmul.mubr.f32.vlgmr.msra.gmra.mrb[4].mxu1 %v209_v4 }
  0xe9   :  { %683 = vmatpush3.msra.mxu0 %v875_v17  ;;  %684 = vmatprep.mubr.msk.f32.mxu0 %vm800_vm0, %v799_v15 }
  0xea   :  { %692 = vmatprep.subr.mxu0 %v799_v15 }
  0xec   :  { %685 = vmatmul.mubr.f32.vlgmr.msra.gmra.mrb[2].mxu0 %v210_v5 }
  0xed   :  { %693 = vmatpush3.msra.mxu0 %v222_v18  ;;  %694 = vmatprep.mubr.msk.f32.mxu0 %vm800_vm0, %v799_v15 }
  0xf0   :  { %695 = vmatmul.mubr.f32.vlgmr.msra.gmra.mrb[4].mxu0 %v209_v4 }
 0x1b3   :  { %v291_v9 = vpop.f32.mrb[0].mxu1 }
 0x1b4   :  { %v681_v10 = vpop.f32.mrb[1].mxu1 }
 0x1b7   :  { %v439_v11 = vpop.f32.mrb[2].mxu1 }
 0x1b8   :  { %v691_v12 = vpop.f32.mrb[3].mxu1 }
 0x1bb   :  { %v215_v13 = vpop.f32.mrb[0].mxu0  ;;  %v585_v14 = vpop.f32.mrb[4].mxu1 }
 0x1bc   :  { %v292_v16 = vadd.f32 %v291_v9, %v215_v13  ;;  %v676_v19 = vpop.f32.mrb[1].mxu0  ;;  %v701_v20 = vpop.f32.mrb[5].mxu1 }
 0x1bf   :  { %v365_v21 = vpop.f32.mrb[2].mxu0 }
 0x1c0   :  { %v366_v22 = vadd.f32 %v365_v21, %v292_v16  ;;  %v686_v23 = vpop.f32.mrb[3].mxu0 }
 0x1c2   :  { %v440_v24 = vadd.f32 %v439_v11, %v366_v22 }
 0x1c3   :  { %v513_v25 = vpop.f32.mrb[4].mxu0 }
 0x1c4   :  { %v514_v17 = vadd.f32 %v513_v25, %v440_v24  ;;  %v696_v18 = vpop.f32.mrb[5].mxu0 }
 0x1c6   :  { %v586_v26 = vadd.f32 %v585_v14, %v514_v17 }
 0x1c8   :  { %v595_v15 = vadd.f32 %v593_v27, %v586_v26 }
 0x1ca   :  { %v596_v28 = vmul.f32 1.442695, %v595_v15 }
 0x1cc   :  { %716 = vpow2.f32 %v596_v28 }
 0x1d6   :  { %v717_v30 = vpop.eup %716 }
 0x1d7   :  { %609 = vst.msk [vmem:[#allocation8] sm:$0xff] %vm139_vm1, %v717_v30  ;;  %v599_v31 = vadd.f32 %v717_v30, %v598_v29 }
 0x1d8   :  { %755 = shalt.err (!%p752_p0)
}
 0x1d9   :  { %s756_s24 = scalar_lea.hbm %s962_s8, 128 }
 0x1da   :  { %p757_p1 = scmp.ne.s32.totalorder %s962_s8, %s756_s24  ;;  %p760_p2 = scmp.lt.u32.totalorder %s756_s24, %s962_s8 }
 0x1dc   :  { %p762_p3 = pnand %p760_p2, %p757_p1 }
 0x1de   :  { %765 = shalt.err (!%p762_p3)
}
 0x1df   :  { %630 = dma.vmem_to_hbm [thread:$0]  %s628_s20, 128, %s962_s8, [#allocation9]   ;;  %vm600_vm2 = vcmp.lt.f32.partialorder %v599_v31, inf }
 0x1e0   :  { %v601_v32 = vsel %vm600_vm2, %v599_v31, 1.0  ;;  %s802_s9 = smov [#allocation7]  }
 0x1e1   :  { %718 = vrcp.f32 %v601_v32  ;;  %s617_s10 = sshll.u32 %s802_s9, 4  ;;  %s618_s10 = int_to_ptr.vmem [resolvable:$true] %s617_s10 }
 0x1e2   :  { %s766_s11 = scalar_lea.vmem %s618_s10, 128  ;;  %p771_p5 = scmp.lt.s32.totalorder %s618_s10, %s618_s10 }
 0x1e3   :  { %p767_p4 = scmp.ne.s32.totalorder %s618_s10, %s766_s11  ;;  %p772_p6 = scmp.lt.s32.totalorder %s766_s11, %s766_s11 }
 0x1e5   :  { %p773_p7 = por %p772_p6, %p771_p5 }
 0x1e7   :  { %p774_p8 = pnand %p773_p7, %p767_p4 }
 0x1eb   :  { %v719_v33 = vpop.eup %718 }
 0x1ec   :  { %v603_v34 = vmul.f32 %v719_v33, %v601_v32 }
 0x1ee   :  { %v604_v35 = vsub.f32 2.0, %v603_v34 }
 0x1f0   :  { %v605_v36 = vmul.f32 %v719_v33, %v604_v35 }
 0x1f2   :  { %v606_v37 = vmul.f32 %v605_v36, %v598_v29 }
 0x1f4   :  { %v607_v38 = vsel %vm600_vm2, %v606_v37, 0.0 }
 0x1f5   :  { %v608_v39 = vadd.f32 1e-08, %v607_v38 }
 0x1f7   :  { %610 = vst.msk [vmem:[#allocation7] sm:$0xff] %vm139_vm1, %v608_v39 }
 0x1f8   :  { %777 = shalt.err (!%p774_p8)
}
 0x1f9   :  { %s778_s13 = scalar_lea.hbm %s961_s7, 128 }
 0x1fa   :  { %p779_p9 = scmp.ne.s32.totalorder %s961_s7, %s778_s13  ;;  %p782_p10 = scmp.lt.u32.totalorder %s778_s13, %s961_s7 }
 0x1fc   :  { %p784_p11 = pnand %p782_p10, %p779_p9 }
 0x1fe   :  { %787 = shalt.err (!%p784_p11)
}
 0x1ff   :  { %620 = dma.vmem_to_hbm [thread:$0]  %s618_s10, 128, %s961_s7, [#allocation3]  }
 0x200   :  { %792 = dma.done.wait [#allocation3], 128  }
 0x201   :  { %793 = vsyncadd [#allocation3], 4294967168 }
 0x202   :  { %794 = dma.done.wait [#allocation9], 128  }
 0x203   :  { %795 = vsyncadd [#allocation9], 4294967168 }
 0x204   :  { %637 = vsyncpa [#allocation3], 1 }
 0x205   :  { %638 = vsyncpa [#allocation9], 1 }
 0x206   :  { %639 = vsyncpa [#allocation4], 1 }
 0x207   :  { %640 = vsyncpa [#allocation6], 1 }

</bundles_post_ra>
